<compile_context>
chip_gen: v7x
topology: tpu7x:2x2x1
jax: 0.10.0
libtpu: 0.0.40
codegen_flags: <defaults>
</compile_context>

<pallas_src>
import functools

import jax
import jax.numpy as jnp
from jax import lax
from jax.experimental import pallas as pl
from jax.experimental.pallas import tpu as pltpu

# lax.dot_general dimension numbers for  A @ B.T  (contract last dims, no batch).
_TRANS_B_DIMS = (((1,), (1,)), ((), ()))

_LANE = 128
_VMEM_BUDGET = 40 * 1024 * 1024   # working-set target (safe on v7x's 64 MiB physical VMEM)
_VMEM_LIMIT = 48 * 1024 * 1024    # raise v5e's 16 MiB scoped default, stay < v7x physical
_MAX_BATCH_TILE = 256


def _round_up(n, m):
    return ((n + m - 1) // m) * m


def _pad_to(x, shape):
    pads = [(0, t - s) for s, t in zip(x.shape, shape)]
    return jnp.pad(x, pads) if any(p for _, p in pads) else x


def _choose_batch_tile(B, S_pad, H_pad, itemsize):
    """Largest batch tile whose double-buffered working set fits the VMEM budget."""
    weights = 2 * (2 * H_pad * H_pad * itemsize + H_pad * 4)       # w1T, w2T, bias
    per_row = (2 * (S_pad * H_pad + 2 * H_pad) * itemsize          # ctx + query + tgt (dbl-buf)
               + 2 * (S_pad + H_pad) * 4)                          # f32 outputs (dbl-buf)
    tb = max(1, (_VMEM_BUDGET - weights) // per_row)
    tb = int(min(tb, _MAX_BATCH_TILE, B))
    if tb >= B and B > 1:
        tb = -(-B // 2)   # cdiv(B, 2): keep >= 2 grid steps so both v7x TCs get work
    return tb


def _attention_kernel(*refs, seq_len, batch_tile, separate_query):
    if separate_query:
        ctx_ref, x_ref, tgt_ref, w1T_ref, w2T_ref, b_ref, comb_ref, attn_ref = refs
    else:
        ctx_ref, tgt_ref, w1T_ref, w2T_ref, b_ref, comb_ref, attn_ref = refs
        x_ref = tgt_ref   # "dot": the query is the target itself

    s_pad = ctx_ref.shape[1]

    # Resident per grid step: weights, bias, padded-lane mask (hoisted out of the row loop).
    w1T = w1T_ref[...]                       # (Hp, Hp) acts on context_vector
    w2T = w2T_ref[...]                       # (Hp, Hp) acts on target
    b = b_ref[...]                           # (1, Hp) f32
    if seq_len < s_pad:
        lane_valid = lax.broadcasted_iota(jnp.int32, (1, s_pad), 1) < seq_len
    else:
        lane_valid = None

    def body(r, carry):
        ctx = ctx_ref[r]                     # (Sp, Hp) compute dtype
        x = x_ref[r]                         # (1, Hp)  query (target or Wa @ target)
        tgt = tgt_ref[r]                     # (1, Hp)

        # scores[s] = sum_h ctx[s, h] * x[h]   -> MXU, no materialized transpose.
        scores = lax.dot_general(x, ctx, _TRANS_B_DIMS,
                                 preferred_element_type=jnp.float32)   # (1, Sp)
        if lane_valid is not None:
            scores = jnp.where(lane_valid, scores, -jnp.inf)

        # softmax over the lane-dense sequence axis, f32 throughout.
        m = jnp.max(scores, axis=-1, keepdims=True)
        e = jnp.exp(scores - m)
        denom = jnp.sum(e, axis=-1, keepdims=True)
        attn = e * pl.reciprocal(denom, approx=True)                   # EUP slot
        attn_ref[r] = attn

        # context vector (1,Sp)@(Sp,Hp) and combine projection (MXU, f32 accumulate).
        cv = jnp.dot(attn.astype(ctx.dtype), ctx,
                     preferred_element_type=jnp.float32)               # (1, Hp)
        comb = (jnp.dot(cv.astype(w1T.dtype), w1T,
                        preferred_element_type=jnp.float32)
                + jnp.dot(tgt, w2T, preferred_element_type=jnp.float32)
                + b)                                                   # (1, Hp)
        comb_ref[r] = comb
        return carry

    unroll = True if batch_tile <= 8 else 8
    lax.fori_loop(0, batch_tile, body, 0, unroll=unroll)


def attention_forward(context, target, params, score_function,
                      *, compute_dtype=jnp.bfloat16):
    """context (B,S,H) f32, target (B,H) f32 -> (combine (B,H) f32, attn (B,S) f32)."""
    assert score_function in ("dot", "general")
    B, S, H = context.shape

    # ---- host-side prep (cheap full-batch XLA ops) -------------------------
    if score_function == "general":
        # Hoisted: one (B,H)x(H,H) GEMM at full MXU utilization; Wa never enters VMEM.
        query = jnp.dot(target, params["Wa"].T,
                        preferred_element_type=jnp.float32,
                        precision=jax.lax.Precision.HIGHEST)
    else:
        query = target
    WT = params["W"].T                        # (2H, H)  == nn.Linear(2H, H).weight.T
    w1T, w2T = WT[:H], WT[H:]                 # act on context_vector / target
    bias = params["b"].reshape(1, H).astype(jnp.float32)

    # ---- pad to lane-dense shapes & pick the batch tile --------------------
    S_pad = _round_up(S, _LANE)
    H_pad = _round_up(H, _LANE)
    itemsize = jnp.dtype(compute_dtype).itemsize
    TB = _choose_batch_tile(B, S_pad, H_pad, itemsize)
    B_pad = _round_up(B, TB)

    ctx_p = _pad_to(context, (B_pad, S_pad, H_pad)).astype(compute_dtype)
    tgt_p = _pad_to(target[:, None, :], (B_pad, 1, H_pad)).astype(compute_dtype)
    w1T_p = _pad_to(w1T, (H_pad, H_pad)).astype(compute_dtype)
    w2T_p = _pad_to(w2T, (H_pad, H_pad)).astype(compute_dtype)
    b_p = _pad_to(bias, (1, H_pad))

    separate_query = score_function == "general"

    row_spec = pl.BlockSpec((TB, 1, H_pad), lambda i: (i, 0, 0))
    weight_spec = pl.BlockSpec((H_pad, H_pad), lambda i: (0, 0))   # resident across grid

    in_specs = [pl.BlockSpec((TB, S_pad, H_pad), lambda i: (i, 0, 0))]   # context, batch-tiled
    inputs = [ctx_p]
    if separate_query:
        q_p = _pad_to(query[:, None, :], (B_pad, 1, H_pad)).astype(compute_dtype)
        in_specs.append(row_spec)
        inputs.append(q_p)
    in_specs += [row_spec, weight_spec, weight_spec,
                 pl.BlockSpec((1, H_pad), lambda i: (0, 0))]
    inputs += [tgt_p, w1T_p, w2T_p, b_p]

    grid = (B_pad // TB,)

    flops = B_pad * (4 * S_pad * H_pad + 4 * H_pad * H_pad)
    bytes_accessed = (itemsize * (B_pad * S_pad * H_pad
                                  + (2 if separate_query else 1) * B_pad * H_pad
                                  + 2 * H_pad * H_pad)
                      + 4 * (H_pad + B_pad * H_pad + B_pad * S_pad))

    kernel = functools.partial(_attention_kernel, seq_len=S, batch_tile=TB,
                               separate_query=separate_query)

    comb3, attn3 = pl.pallas_call(
        kernel,
        out_shape=(jax.ShapeDtypeStruct((B_pad, 1, H_pad), jnp.float32),
                   jax.ShapeDtypeStruct((B_pad, 1, S_pad), jnp.float32)),
        grid=grid,
        in_specs=in_specs,
        out_specs=(pl.BlockSpec((TB, 1, H_pad), lambda i: (i, 0, 0)),
                   pl.BlockSpec((TB, 1, S_pad), lambda i: (i, 0, 0))),
        compiler_params=pltpu.CompilerParams(
            dimension_semantics=("parallel",),
            vmem_limit_bytes=_VMEM_LIMIT),
        cost_estimate=pl.CostEstimate(
            flops=flops, transcendentals=B_pad * (S_pad + 1),
            bytes_accessed=bytes_accessed),
    )(*inputs)

    # TODO(synk): if exposed DMA still dominates at production sizes, try
    # pipeline_mode=pl.Buffered(3) on the context BlockSpec.
    return comb3[:B, 0, :H], attn3[:B, 0, :S]


def _reference(context, target, params, score_function):
    """Plain-JAX reference mirroring the PyTorch forward (highest precision)."""
    hp = jax.lax.Precision.HIGHEST
    if score_function == "general":
        x = jnp.dot(target, params["Wa"].T, precision=hp)
    else:
        x = target
    scores = jnp.einsum("bsh,bh->bs", context, x, precision=hp)
    attn = jax.nn.softmax(scores, axis=-1)
    cv = jnp.einsum("bs,bsh->bh", attn, context, precision=hp)
    cat = jnp.concatenate([cv, target], axis=1)
    comb = jnp.dot(cat, params["W"].T, precision=hp) + params["b"]
    return comb, attn


if __name__ == "__main__":
    B, S, H = 2, 8, 32
    key = jax.random.PRNGKey(0)
    k_ctx, k_tgt, k_w, k_b, k_wa = jax.random.split(key, 5)

    context = jax.random.normal(k_ctx, (B, S, H), dtype=jnp.float32)
    target = jax.random.normal(k_tgt, (B, H), dtype=jnp.float32)

    # Deterministic parameter init (shapes from the module's __init__).
    params = {
        "W": 0.1 * jax.random.normal(k_w, (H, 2 * H), dtype=jnp.float32),
        "b": 0.1 * jax.random.normal(k_b, (H,), dtype=jnp.float32),
        "Wa": 0.1 * jax.random.normal(k_wa, (H, H), dtype=jnp.float32),
    }

    # bf16 is the production default (memory-bound kernel); f32 checks the logic tightly.
    for compute_dtype, tol in ((jnp.float32, 2e-3), (jnp.bfloat16, 2e-2)):
        for score_function in ("dot", "general"):
            comb, attn = attention_forward(context, target, params, score_function,
                                           compute_dtype=compute_dtype)
            comb = jax.block_until_ready(comb)
            attn = jax.block_until_ready(attn)

            comb_ref, attn_ref = _reference(context, target, params, score_function)
            assert comb.shape == (B, H) and attn.shape == (B, S)
            assert jnp.allclose(comb, comb_ref, atol=tol, rtol=tol), (
                score_function, compute_dtype)
            assert jnp.allclose(attn, attn_ref, atol=tol, rtol=tol), (
                score_function, compute_dtype)

    print("KERNEL_OK")
</pallas_src>

<mosaic_0001>
module attributes {stable_mosaic.version = 11 : i64} {
  func.func @_attention_kernel(%arg0: i32, %arg1: memref<1x128x128xf32, #tpu.memory_space<vmem>>, %arg2: memref<1x1x128xf32, #tpu.memory_space<vmem>>, %arg3: memref<128x128xf32, #tpu.memory_space<vmem>>, %arg4: memref<128x128xf32, #tpu.memory_space<vmem>>, %arg5: memref<1x128xf32, #tpu.memory_space<vmem>>, %arg6: memref<1x1x128xf32, #tpu.memory_space<vmem>>, %arg7: memref<1x1x128xf32, #tpu.memory_space<vmem>>) attributes {dimension_semantics = [#tpu.dimension_semantics<parallel>], iteration_bounds = array<i64: 2>, scalar_prefetch = 0 : i64, scratch_operands = 0 : i64, tpu.core_type = #tpu.core_type<tc>, window_params = [{transform_indices = @transform_0, window_bounds = array<i64: 1, 128, 128>}, {transform_indices = @transform_1, window_bounds = array<i64: 1, 1, 128>}, {pipeline_mode = #tpu.pipeline_mode<synchronous>, transform_indices = @transform_2, window_bounds = array<i64: 128, 128>}, {pipeline_mode = #tpu.pipeline_mode<synchronous>, transform_indices = @transform_3, window_bounds = array<i64: 128, 128>}, {pipeline_mode = #tpu.pipeline_mode<synchronous>, transform_indices = @transform_4, window_bounds = array<i64: 1, 128>}, {transform_indices = @transform_5, window_bounds = array<i64: 1, 1, 128>}, {transform_indices = @transform_6, window_bounds = array<i64: 1, 1, 128>}]} {
    %c0 = arith.constant 0 : index
    %c0_0 = arith.constant 0 : index
    %0 = vector.load %arg3[%c0, %c0_0] : memref<128x128xf32, #tpu.memory_space<vmem>>, vector<128x128xf32>
    %c0_1 = arith.constant 0 : index
    %c0_2 = arith.constant 0 : index
    %1 = vector.load %arg4[%c0_1, %c0_2] : memref<128x128xf32, #tpu.memory_space<vmem>>, vector<128x128xf32>
    %c0_3 = arith.constant 0 : index
    %c0_4 = arith.constant 0 : index
    %2 = vector.load %arg5[%c0_3, %c0_4] : memref<1x128xf32, #tpu.memory_space<vmem>>, vector<1x128xf32>
    %3 = tpu.iota {dimensions = array<i32: 1>} : vector<1x128xi32>
    %c8_i32 = arith.constant 8 : i32
    %4 = vector.broadcast %c8_i32 : i32 to vector<1x128xi32>
    %5 = arith.cmpi slt, %3, %4 : vector<1x128xi32>
    %c0_i32 = arith.constant 0 : i32
    %6 = arith.index_cast %c0_i32 : i32 to index
    %c0_5 = arith.constant 0 : index
    %c0_6 = arith.constant 0 : index
    %7 = vector.load %arg1[%6, %c0_5, %c0_6] : memref<1x128x128xf32, #tpu.memory_space<vmem>>, vector<1x128x128xf32>
    %8 = vector.shape_cast %7 : vector<1x128x128xf32> to vector<128x128xf32>
    %9 = arith.index_cast %c0_i32 : i32 to index
    %c0_7 = arith.constant 0 : index
    %c0_8 = arith.constant 0 : index
    %10 = vector.load %arg2[%9, %c0_7, %c0_8] : memref<1x1x128xf32, #tpu.memory_space<vmem>>, vector<1x1x128xf32>
    %11 = vector.shape_cast %10 : vector<1x1x128xf32> to vector<1x128xf32>
    %12 = arith.index_cast %c0_i32 : i32 to index
    %c0_9 = arith.constant 0 : index
    %c0_10 = arith.constant 0 : index
    %13 = vector.load %arg2[%12, %c0_9, %c0_10] : memref<1x1x128xf32, #tpu.memory_space<vmem>>, vector<1x1x128xf32>
    %14 = vector.shape_cast %13 : vector<1x1x128xf32> to vector<1x128xf32>
    %cst = arith.constant dense<0.000000e+00> : vector<1x128xf32>
    %15 = tpu.matmul %11, %8, %cst {dimension_numbers = #tpu.dot_dimension_numbers<[1], [1], [0], [0], [0, 0, 1, 0], [], []>} : vector<1x128xf32>, vector<128x128xf32>, vector<1x128xf32> -> vector<1x128xf32>
    %cst_11 = arith.constant 0xFF800000 : f32
    %16 = vector.broadcast %cst_11 : f32 to vector<1x128xf32>
    %17 = arith.select %5, %15, %16 : vector<1x128xi1>, vector<1x128xf32>
    %cst_12 = arith.constant dense<0xFF800000> : vector<1xf32>
    %18 = vector.multi_reduction <maximumf>, %17, %cst_12 [1] : vector<1x128xf32> to vector<1xf32>
    %19 = vector.shape_cast %18 : vector<1xf32> to vector<1x1xf32>
    %20 = vector.broadcast %19 : vector<1x1xf32> to vector<1x128xf32>
    %21 = arith.subf %17, %20 : vector<1x128xf32>
    %22 = math.exp %21 : vector<1x128xf32>
    %cst_13 = arith.constant dense<0.000000e+00> : vector<1xf32>
    %23 = vector.multi_reduction <add>, %22, %cst_13 [1] : vector<1x128xf32> to vector<1xf32>
    %24 = vector.shape_cast %23 : vector<1xf32> to vector<1x1xf32>
    %25 = tpu.reciprocal %24 {approx = true} : vector<1x1xf32> -> vector<1x1xf32>
    %26 = vector.broadcast %25 : vector<1x1xf32> to vector<1x128xf32>
    %27 = arith.mulf %22, %26 : vector<1x128xf32>
    %28 = arith.index_cast %c0_i32 : i32 to index
    %c0_14 = arith.constant 0 : index
    %c0_15 = arith.constant 0 : index
    %29 = vector.load %arg7[%28, %c0_14, %c0_15] : memref<1x1x128xf32, #tpu.memory_space<vmem>>, vector<1x1x128xf32>
    %30 = vector.shape_cast %29 : vector<1x1x128xf32> to vector<1x128xf32>
    %31 = vector.shape_cast %27 : vector<1x128xf32> to vector<1x1x128xf32>
    tpu.vector_store %arg7[%28, %c0_14, %c0_15], %31 {strides = array<i32>} : memref<1x1x128xf32, #tpu.memory_space<vmem>>, vector<1x1x128xf32>,
    %cst_16 = arith.constant dense<0.000000e+00> : vector<1x128xf32>
    %32 = tpu.matmul %27, %8, %cst_16 {dimension_numbers = #tpu.dot_dimension_numbers<[1], [0], [0], [1], [0, 0, 1, 1], [], []>} : vector<1x128xf32>, vector<128x128xf32>, vector<1x128xf32> -> vector<1x128xf32>
    %cst_17 = arith.constant dense<0.000000e+00> : vector<1x128xf32>
    %33 = tpu.matmul %32, %0, %cst_17 {dimension_numbers = #tpu.dot_dimension_numbers<[1], [0], [0], [1], [0, 0, 1, 1], [], []>} : vector<1x128xf32>, vector<128x128xf32>, vector<1x128xf32> -> vector<1x128xf32>
    %cst_18 = arith.constant dense<0.000000e+00> : vector<1x128xf32>
    %34 = tpu.matmul %14, %1, %cst_18 {dimension_numbers = #tpu.dot_dimension_numbers<[1], [0], [0], [1], [0, 0, 1, 1], [], []>} : vector<1x128xf32>, vector<128x128xf32>, vector<1x128xf32> -> vector<1x128xf32>
    %35 = arith.addf %33, %34 : vector<1x128xf32>
    %36 = arith.addf %35, %2 : vector<1x128xf32>
    %37 = arith.index_cast %c0_i32 : i32 to index
    %c0_19 = arith.constant 0 : index
    %c0_20 = arith.constant 0 : index
    %38 = vector.load %arg6[%37, %c0_19, %c0_20] : memref<1x1x128xf32, #tpu.memory_space<vmem>>, vector<1x1x128xf32>
    %39 = vector.shape_cast %38 : vector<1x1x128xf32> to vector<1x128xf32>
    %40 = vector.shape_cast %36 : vector<1x128xf32> to vector<1x1x128xf32>
    tpu.vector_store %arg6[%37, %c0_19, %c0_20], %40 {strides = array<i32>} : memref<1x1x128xf32, #tpu.memory_space<vmem>>, vector<1x1x128xf32>,
    %c1_i32 = arith.constant 1 : i32
    return
  }
  func.func @transform_0(%arg0: i32) -> (i32, i32, i32) {
    %c0_i32 = arith.constant 0 : i32
    %c0_i32_0 = arith.constant 0 : i32
    %c0_i32_1 = arith.constant 0 : i32
    return %arg0, %c0_i32, %c0_i32_0 : i32, i32, i32
  }
  func.func @transform_1(%arg0: i32) -> (i32, i32, i32) {
    %c0_i32 = arith.constant 0 : i32
    %c0_i32_0 = arith.constant 0 : i32
    %c0_i32_1 = arith.constant 0 : i32
    return %arg0, %c0_i32, %c0_i32_0 : i32, i32, i32
  }
  func.func @transform_2(%arg0: i32) -> (i32, i32) {
    %c0_i32 = arith.constant 0 : i32
    %c0_i32_0 = arith.constant 0 : i32
    %c0_i32_1 = arith.constant 0 : i32
    return %c0_i32, %c0_i32_0 : i32, i32
  }
  func.func @transform_3(%arg0: i32) -> (i32, i32) {
    %c0_i32 = arith.constant 0 : i32
    %c0_i32_0 = arith.constant 0 : i32
    %c0_i32_1 = arith.constant 0 : i32
    return %c0_i32, %c0_i32_0 : i32, i32
  }
  func.func @transform_4(%arg0: i32) -> (i32, i32) {
    %c0_i32 = arith.constant 0 : i32
    %c0_i32_0 = arith.constant 0 : i32
    %c0_i32_1 = arith.constant 0 : i32
    return %c0_i32, %c0_i32_0 : i32, i32
  }
  func.func @transform_5(%arg0: i32) -> (i32, i32, i32) {
    %c0_i32 = arith.constant 0 : i32
    %c0_i32_0 = arith.constant 0 : i32
    %c0_i32_1 = arith.constant 0 : i32
    return %arg0, %c0_i32, %c0_i32_0 : i32, i32, i32
  }
  func.func @transform_6(%arg0: i32) -> (i32, i32, i32) {
    %c0_i32 = arith.constant 0 : i32
    %c0_i32_0 = arith.constant 0 : i32
    %c0_i32_1 = arith.constant 0 : i32
    return %arg0, %c0_i32, %c0_i32_0 : i32, i32, i32
  }
}

</mosaic_0001>

<bundles_post_ra>
// kernel: tpu_custom_call.1
= control target key start
LH: loop header
LB: loop body
LE: loop exit
PB: predicated region body
PF: predicated region fallthrough
CT: control target
= control target key end

     0   :  { %12 = vsyncpa [#allocation3], 0  ;;  %s1804_s0 = inlined_call_operand.hbm [shape: f32[2,128,128], index: 0, kind: input, shape index: {}]   ;;  %s1805_s1 = inlined_call_operand.vmem [shape: f32[2,1,128], index: 1, kind: input, shape index: {}]   ;;  %s1806_s2 = inlined_call_operand.hbm [shape: f32[128,128], index: 2, kind: input, shape index: {}]   ;;  %s1807_s3 = inlined_call_operand.hbm [shape: f32[128,128], index: 3, kind: input, shape index: {}]   ;;  %s1808_s4 = inlined_call_operand.vmem [shape: f32[1,128], index: 4, kind: input, shape index: {}]   ;;  %s1809_s5 = inlined_call_operand.hbm [shape: f32[2,1,128], index: 5, kind: output, shape index: {0}]   ;;  %s1810_s6 = inlined_call_operand.hbm [shape: f32[2,1,128], index: 6, kind: output, shape index: {1}]  }
   0x1   :  { %14 = vsyncpa [#allocation3 + $0x1], 0 }
   0x2   :  { %15 = vsyncpa [#allocation6], 0 }
   0x3   :  { %16 = vsyncpa [#allocation4], 0 }
   0x4   :  { %18 = vsyncpa [#allocation4 + $0x1], 0 }
   0x5   :  { %19 = vsyncpa [#allocation10], 0 }
   0x6   :  { %21 = vsyncpa [#allocation10 + $0x1], 0  ;;  %s1460_s21 = smov 0   ;;  %s1462_s22 = smov 0  }
   0x7   :  { %s1464_s23 = smov 0   ;;  %s1466_s24 = smov 0  }
   0x8 LB: > { %s1481_s25 = sadd.s32 4294967295, %s1413_s24   ;;  %s823_s26 = sadd.s32 4294967294, %s1413_s24   ;;  %s1413_s24 = sphi %s1466_s24, %s1830_s24   ;;  %s1409_s23 = sphi %s1464_s23, %s1829_s23   ;;  %s1405_s22 = sphi %s1462_s22, %s1828_s22   ;;  %s1401_s21 = sphi %s1460_s21, %s1827_s21  }
   0x9   : > { %p47_p0 = scmp.ne.s32.totalorder %s1405_s22, %s1401_s21  ;;  %p1811_p1 = scmp.eq.s32.totalorder %s1481_s25, 0 }
   0xa   : > { %p166_p3 = scmp.eq.s32.totalorder %s823_s26, 1  ;;  %p824_p5 = scmp.ge.s32.totalorder %s1413_s24, 1 }
   0xb   : > { %p1490_p4 = por %p1811_p1, %p47_p0  ;;  %p199_p7 = scmp.lt.s32.totalorder %s1413_s24, 3 }
   0xc   : > { %p1495_p6 = por %p166_p3, %p47_p0  ;;  %s1415_s30 = smov [#allocation5]  }
   0xd   : > { %s1814_s27 = scalar_select %p1490_p4, 1, 0 }
   0xe   : > { %s1815_s28 = scalar_select %p1495_p6, 1, 0 }
   0xf   : > { %p1500_p8 = pnand %p824_p5, %p199_p7  ;;  %s211_s7 = sshll.u32 %s1415_s30, 4  ;;  %s1504_s7 = int_to_ptr.vmem [resolvable:$true] %s211_s7 }
  0x10   : > { %s1416_s9 = smov [#allocation7]   ;;  %s1225_s13 = scalar_lea.hbm %s1806_s2, 2048 }
  0x11   : > { %p1158_p9 = pneg %p1500_p8  ;;  %s224_s10 = sshll.u32 %s1416_s9, 4  ;;  %s1515_s10 = int_to_ptr.vmem [resolvable:$true] %s224_s10 }
  0x12   : > { %p1226_p12 = scmp.ne.s32.totalorder %s1806_s2, %s1225_s13  ;;  %p1232_p5 = scmp.lt.u32.totalorder %s1225_s13, %s1806_s2 }
  0x13   : > { %p1511_p11 = pnand %p1158_p9, %p1811_p1 }
  0x15   : > { %p1227_p13 = pneg %p1511_p11 }
  0x17   : > { %p1228_p0 = pnand %p1227_p13, %p1226_p12 }
  0x19   : > { %p1229_p3 = pneg %p1228_p0 }
  0x1b   : > { %p1234_p7 = pnand %p1232_p5, %p1229_p3 }
  0x1d   : > { %1237 = shalt.err (!%p1234_p7)
}
  0x1e   : > { %s1238_s18 = scalar_lea.vmem %s1504_s7, 2048  ;;  %p1246_p2 = scmp.lt.s32.totalorder %s1504_s7, %s1504_s7 }
  0x1f   : > { %p1239_p9 = scmp.ne.s32.totalorder %s1504_s7, %s1238_s18  ;;  %p1247_p12 = scmp.lt.s32.totalorder %s1238_s18, %s1238_s18 }
  0x21   : > { %p1241_p10 = pnand %p1239_p9, %p1227_p13  ;;  %p1248_p0 = por %p1247_p12, %p1246_p2 }
  0x23   : > { %p1242_p1 = pneg %p1241_p10 }
  0x25   : > { %p1249_p6 = pnand %p1248_p0, %p1242_p1 }
  0x27   : > { %1252 = shalt.err (!%p1249_p6)
}
  0x28   : > { %s1417_s19 = smov 128   ;;  %s1418_s20 = smov 8  }
  0x29   : > { %1161 = dma.hbm_to_vmem [thread:$0]  (!%p1511_p11), %s1806_s2, 2048, %s1504_s7, [#allocation6], %s1417_s19, %s1417_s19, %s1418_s20  }
  0x2a   : > { %s1253_s12 = scalar_lea.hbm %s1807_s3, 2048 }
  0x2b   : > { %p1254_p1 = scmp.ne.s32.totalorder %s1807_s3, %s1253_s12  ;;  %p1260_p10 = scmp.lt.u32.totalorder %s1253_s12, %s1807_s3 }
  0x2d   : > { %p1256_p2 = pnand %p1254_p1, %p1227_p13 }
  0x2f   : > { %p1257_p6 = pneg %p1256_p2 }
  0x31   : > { %p1262_p3 = pnand %p1260_p10, %p1257_p6 }
  0x33   : > { %1265 = shalt.err (!%p1262_p3)
}
  0x34   : > { %s1266_s7 = scalar_lea.vmem %s1515_s10, 2048  ;;  %p1274_p12 = scmp.lt.s32.totalorder %s1515_s10, %s1515_s10 }
  0x35   : > { %p1267_p5 = scmp.ne.s32.totalorder %s1515_s10, %s1266_s7  ;;  %p1275_p0 = scmp.lt.s32.totalorder %s1266_s7, %s1266_s7 }
  0x37   : > { %p1269_p7 = pnand %p1267_p5, %p1227_p13  ;;  %p1276_p1 = por %p1275_p0, %p1274_p12 }
  0x39   : > { %p1270_p9 = pneg %p1269_p7 }
  0x3b   : > { %p1277_p2 = pnand %p1276_p1, %p1270_p9 }
  0x3d   : > { %1280 = shalt.err (!%p1277_p2)
}
  0x3e   : > { %1164 = dma.hbm_to_vmem [thread:$0]  (!%p1511_p11), %s1807_s3, 2048, %s1515_s10, [#allocation6], %s1417_s19, %s1417_s19, %s1418_s20  }
  0x3f   : > { %s1576_s8 = sadd.s32 1, %s1413_s24   ;;  %s34_s26 = sadd.s32 1, %s1409_s23 }
  0x40   : > { %s31_s30 = ssub.s32 %s1413_s24, %s1576_s8  ;;  %p41_p13 = scmp.ne.s32.totalorder %s1409_s23, %s1405_s22 }
  0x41   : > { %p32_p6 = scmp.eq.s32.totalorder %s31_s30, 0  ;;  %p42_p10 = scmp.eq.s32.totalorder %s1413_s24, 0 }
  0x42   : > { %p1818_p3 = scmp.eq.s32.totalorder %s1481_s25, 1  ;;  %p1178_p7 = scmp.lt.s32.totalorder %s1413_s24, 2 }
  0x43   : > { %s1592_s11 = scalar_select %p32_p6, %s1409_s23, %s34_s26  }
  0x44   : > { %p1586_p5 = por %p1818_p3, %p41_p13  ;;  %p43_p9 = por %p42_p10, %p41_p13 }
  0x45   : > { %s241_s12 = sand.u32 1, %s1409_s23   ;;  %s839_s10 = sshll.u32 %s1413_s24, 11 }
  0x46   : > { %s1819_s9 = scalar_select %p1586_p5, 1, 0 }
  0x47   : > { %s828_s13 = sshll.u32 %s241_s12, 7  ;;  %s1599_s16 = scalar_lea.hbm %s1804_s0, %s839_s10 }
  0x48   : > { %s245_s7 = scalar_lea.vmem [#allocation2], %s828_s13  ;;  %p1603_p11 = pnand %p1178_p7, %p43_p9 }
  0x49   : > { %s252_s17 = sshll.u32 %s245_s7, 4  ;;  %s1607_s26 = scalar_lea.sflag [#allocation3], %s241_s12  ;;  %s1601_s17 = int_to_ptr.vmem [resolvable:$true] %s252_s17 }
  0x4a   : > { %s1281_s30 = scalar_lea.hbm %s1599_s16, 2048  ;;  %p1283_p0 = pneg %p1603_p11 }
  0x4b   : > { %p1282_p12 = scmp.ne.s32.totalorder %s1599_s16, %s1281_s30  ;;  %s1286_s14 = scalar_lea.hbm %s1804_s0, 4096 }
  0x4c   : > { %p1287_p13 = scmp.lt.u32.totalorder %s1599_s16, %s1804_s0  ;;  %p1288_p6 = scmp.lt.u32.totalorder %s1286_s14, %s1281_s30 }
  0x4d   : > { %p1284_p1 = pnand %p1283_p0, %p1282_p12  ;;  %p1290_p3 = scmp.lt.u32.totalorder %s1281_s30, %s1599_s16 }
  0x4e   : > { %p1289_p10 = por %p1288_p6, %p1287_p13 }
  0x4f   : > { %p1285_p2 = pneg %p1284_p1 }
  0x50   : > { %p1291_p7 = por %p1290_p3, %p1289_p10 }
  0x52   : > { %p1292_p9 = pnand %p1291_p7, %p1285_p2 }
  0x54   : > { %1295 = shalt.err (!%p1292_p9)
}
  0x55   : > { %s1296_s12 = scalar_lea.vmem %s1601_s17, 2048  ;;  %s1419_s13 = smov [#allocation2]  }
  0x56   : > { %p1297_p12 = scmp.ne.s32.totalorder %s1601_s17, %s1296_s12  ;;  %s1301_s10 = sshll.u32 %s1419_s13, 4  ;;  %s1302_s10 = int_to_ptr.vmem [resolvable:$false] %s1301_s10 }
  0x57   : > { %s1303_s15 = scalar_lea.vmem %s1302_s10, 4096  ;;  %p1304_p4 = scmp.lt.s32.totalorder %s1601_s17, %s1302_s10 }
  0x58   : > { %p1299_p1 = pnand %p1297_p12, %p1283_p0  ;;  %p1305_p13 = scmp.lt.s32.totalorder %s1303_s15, %s1296_s12 }
  0x5a   : > { %p1300_p5 = pneg %p1299_p1  ;;  %p1306_p6 = por %p1305_p13, %p1304_p4 }
  0x5c   : > { %p1307_p10 = pnand %p1306_p6, %p1300_p5 }
  0x5e   : > { %1310 = shalt.err (!%p1307_p10)
}
  0x5f   : > { %1168 = dma.hbm_to_vmem [thread:$0]  (!%p1603_p11), %s1599_s16, 2048, %s1601_s17, %s1607_s26, %s1417_s19, %s1417_s19, %s1418_s20  }
  0x60   : > { %270 = sbr.rel (%p1500_p8) target bundleno = 1142 (0x476), region = 40  ;;  %s1641_s30 = sand.u32 (!%p1500_p8), 1, %s1405_s22  }
  0x61   : > { %s832_s14 = sshll.u32 (!%p1500_p8), %s1641_s30, 7  ;;  %s273_s7 = scalar_lea.sflag (!%p1500_p8), [#allocation3], %s1641_s30 }
  0x62   : > { %s1645_s12 = scalar_lea.vmem (!%p1500_p8), [#allocation2], %s832_s14  ;;  %p1821_p4 = scmp.ne.s32.totalorder (!%p1500_p8), %s1814_s27, 0 }
  0x67   : > { %1384 = dma.done.wait (%p1821_p4), %s273_s7, 2048  }
  0x68   : > { %1386 = vsyncadd (%p1821_p4), %s273_s7, 4294965248  ;;  %p1822_p5 = scmp.eq.s32.totalorder %s1481_s25, 0 }
  0x6a   : > { %1388 = dma.done.wait (%p1822_p5), [#allocation6], 4096   ;;  %p1823_p8 = pmov %p1822_p5 }
  0x6b   : > { %v1420_v0 = vmov 0.0|0.0   ;;  %vm1421_vm0 = vmmov 0   ;;  %v1422_v1 = vmov 0.0   ;;  %v358_v2 = vld [vmem:[%s1645_s12] sm:$0xff]  ;;  %v359_v3 = vld [vmem:[%s1645_s12 + $0x8] sm:$0xff]  ;;  %v360_v5 = vld [vmem:[%s1645_s12 + $0x10] sm:$0xff]  ;;  %v355_v27 = vlaneseq }
  0x6c   : > { %1390 = vsyncadd (%p1823_p8), [#allocation6], 4294963200  ;;  %1048 = vmatprep.subr.bf16.mxu0 %v1420_v0  ;;  %940 = vmatprep.mubr.msk.f32.mxu0 %vm1421_vm0, %v1422_v1  ;;  %v1049_v4 = vpack.c.bf16 %v359_v3, %v358_v2  ;;  %v361_v6 = vld [vmem:[%s1645_s12 + $0x18] sm:$0xff]  ;;  %v362_v8 = vld [vmem:[%s1645_s12 + $0x20] sm:$0xff]  ;;  %p319_p11 = scmp.lt.s32.totalorder %s1481_s25, 1  ;;  %vm446_vm2 = vcmask 1040384  }
  0x6d   : > { %1072 = vmatprep.subr.bf16.mxu1 %v1420_v0  ;;  %975 = vmatprep.mubr.msk.f32.mxu1 %vm1421_vm0, %v1422_v1  ;;  %v1052_v7 = vpack.c.bf16 %v361_v6, %v360_v5  ;;  %v363_v9 = vld [vmem:[%s1645_s12 + $0x28] sm:$0xff]  ;;  %v364_v11 = vld [vmem:[%s1645_s12 + $0x30] sm:$0xff]  ;;  %v365_v12 = vld [vmem:[%s1645_s12 + $0x38] sm:$0xff]  ;;  %v356_v28 = vand.u32 127, %v355_v27  ;;  %s318_s16 = scalar_lea.vmem [#allocation9], %s1641_s30  ;;  %s835_s17 = sshll.u32 %s1481_s25, 4 }
  0x6e   : > { %1050 = vmatpush3.bf16.xpose.msra.mxu0 %v1049_v4  ;;  %1074 = vmatpush3.bf16.msra.mxu1 %v1049_v4  ;;  %v1055_v10 = vpack.c.bf16 %v363_v9, %v362_v8  ;;  %v1058_v13 = vpack.c.bf16 %v365_v12, %v364_v11  ;;  %v366_v14 = vld [vmem:[%s1645_s12 + $0x40] sm:$0xff]  ;;  %v367_v15 = vld [vmem:[%s1645_s12 + $0x48] sm:$0xff]  ;;  %v368_v17 = vld [vmem:[%s1645_s12 + $0x50] sm:$0xff]  ;;  %s320_s27 = scalar_select %p319_p11, %s1481_s25, 1 }
  0x6f   : > { %1051 = vmatprep.subr.bf16.mxu0 %v1420_v0  ;;  %1075 = vmatprep.subr.bf16.mxu1 %v1420_v0  ;;  %v1061_v16 = vpack.c.bf16 %v367_v15, %v366_v14  ;;  %v369_v18 = vld [vmem:[%s1645_s12 + $0x58] sm:$0xff]  ;;  %v370_v20 = vld [vmem:[%s1645_s12 + $0x60] sm:$0xff]  ;;  %v371_v21 = vld [vmem:[%s1645_s12 + $0x68] sm:$0xff]  ;;  %vm357_vm1 = vcmp.lt.s32.totalorder %v356_v28, 8  ;;  %s1729_s13 = scalar_lea.hbm %s1810_s6, %s835_s17  ;;  %s701_s10 = sshll.u32 %s318_s16, 4  ;;  %s702_s10 = int_to_ptr.vmem [resolvable:$true] %s701_s10 }
  0x70   : > { %v1064_v19 = vpack.c.bf16 %v369_v18, %v368_v17  ;;  %v1067_v22 = vpack.c.bf16 %v371_v21, %v370_v20  ;;  %v372_v23 = vld [vmem:[%s1645_s12 + $0x70] sm:$0xff]  ;;  %v373_v24 = vld [vmem:[%s1645_s12 + $0x78] sm:$0xff]  ;;  %s321_s20 = scalar_lea.vmem %s1805_s1, %s320_s27  ;;  %v322_v38 = vld [vmem:[#allocation5] sm:$0xff]  ;;  %s676_s15 = scalar_lea.sflag [#allocation10], %s1641_s30 }
  0x71   : > { %v1070_v25 = vpack.c.bf16 %v373_v24, %v372_v23  ;;  %v1698_v26 = vld [vmem:[%s321_s20] sm:$0x1]  ;;  %v323_v39 = vld [vmem:[#allocation5 + $0x8] sm:$0xff]  ;;  %v324_v41 = vld [vmem:[#allocation5 + $0x10] sm:$0xff]  ;;  %s1311_s14 = scalar_lea.vmem %s702_s10, 16  ;;  %p1824_p2 = scmp.ne.s32.totalorder %s1819_s9, 0 }
  0x72   : > { %1077 = vmatpush3.bf16.msra.mxu1 %v1052_v7  ;;  %v1121_v40 = vpack.c.bf16 %v323_v39, %v322_v38  ;;  %v325_v42 = vld [vmem:[#allocation5 + $0x18] sm:$0xff]  ;;  %v326_v44 = vld [vmem:[#allocation5 + $0x20] sm:$0xff]  ;;  %v327_v45 = vld [vmem:[#allocation5 + $0x28] sm:$0xff]  ;;  %p1312_p0 = scmp.ne.s32.totalorder %s702_s10, %s1311_s14  ;;  %s1423_s7 = smov [#allocation9]  }
  0x73   : > { %1078 = vmatprep.subr.bf16.mxu1 %v1420_v0  ;;  %v1124_v43 = vpack.c.bf16 %v325_v42, %v324_v41  ;;  %v1127_v46 = vpack.c.bf16 %v327_v45, %v326_v44  ;;  %v328_v47 = vld [vmem:[#allocation5 + $0x30] sm:$0xff]  ;;  %v329_v48 = vld [vmem:[#allocation5 + $0x38] sm:$0xff]  ;;  %v330_v50 = vld [vmem:[#allocation5 + $0x40] sm:$0xff]  ;;  %s1315_s12 = sshll.u32 %s1423_s7, 4  ;;  %s1316_s12 = int_to_ptr.vmem [resolvable:$false] %s1315_s12 }
  0x74   : > { %v1130_v49 = vpack.c.bf16 %v329_v48, %v328_v47  ;;  %v331_v51 = vld [vmem:[#allocation5 + $0x48] sm:$0xff]  ;;  %v332_v53 = vld [vmem:[#allocation5 + $0x50] sm:$0xff]  ;;  %v333_v54 = vld [vmem:[#allocation5 + $0x58] sm:$0xff]  ;;  %p1313_p3 = pnand %p1312_p0, %p1824_p2  ;;  %s1317_s27 = scalar_lea.vmem %s1316_s12, 32 }
  0x75   : > { %v1133_v52 = vpack.c.bf16 %v331_v51, %v330_v50  ;;  %v1136_v55 = vpack.c.bf16 %v333_v54, %v332_v53  ;;  %v334_v56 = vld [vmem:[#allocation5 + $0x60] sm:$0xff]  ;;  %v335_v57 = vld [vmem:[#allocation5 + $0x68] sm:$0xff]  ;;  %v336_v59 = vld [vmem:[#allocation5 + $0x70] sm:$0xff]  ;;  %p1318_p9 = scmp.lt.s32.totalorder %s702_s10, %s1316_s12  ;;  %p1319_p12 = scmp.lt.s32.totalorder %s1317_s27, %s1311_s14 }
  0x76   : > { %1053 = vmatpush3.bf16.xpose.msra.mxu0 %v1052_v7  ;;  %1080 = vmatpush3.bf16.msra.mxu1 %v1055_v10  ;;  %v1139_v58 = vpack.c.bf16 %v335_v57, %v334_v56  ;;  %v337_v60 = vld [vmem:[#allocation5 + $0x78] sm:$0xff]  ;;  %v338_v63 = vld [vmem:[#allocation7] sm:$0xff]  ;;  %v339_v2 = vld [vmem:[#allocation7 + $0x8] sm:$0xff]  ;;  %p1314_p7 = pneg %p1313_p3 }
  0x77   : > { %1054 = vmatprep.subr.bf16.mxu0 %v1420_v0  ;;  %1081 = vmatprep.subr.bf16.mxu1 %v1420_v0  ;;  %v1142_v61 = vpack.c.bf16 %v337_v60, %v336_v59  ;;  %v1097_v4 = vpack.c.bf16 %v339_v2, %v338_v63  ;;  %v340_v6 = vld [vmem:[#allocation7 + $0x10] sm:$0xff]  ;;  %v341_v7 = vld [vmem:[#allocation7 + $0x18] sm:$0xff]  ;;  %v342_v9 = vld [vmem:[#allocation7 + $0x20] sm:$0xff]  ;;  %p1320_p1 = por %p1319_p12, %p1318_p9 }
  0x78   : > { %v1100_v8 = vpack.c.bf16 %v341_v7, %v340_v6  ;;  %v344_v12 = vld [vmem:[#allocation7 + $0x30] sm:$0xff]  ;;  %v346_v15 = vld [vmem:[#allocation7 + $0x40] sm:$0xff]  ;;  %v349_v18 = vld [vmem:[#allocation7 + $0x58] sm:$0xff] }
  0x79   : > { %v350_v20 = vld [vmem:[#allocation7 + $0x60] sm:$0xff]  ;;  %v351_v21 = vld [vmem:[#allocation7 + $0x68] sm:$0xff]  ;;  %v352_v23 = vld [vmem:[#allocation7 + $0x70] sm:$0xff]  ;;  %p1321_p13 = pnand %p1320_p1, %p1314_p7 }
  0x7a   : > { %1083 = vmatpush3.bf16.msra.mxu1 %v1058_v13  ;;  %v353_v24 = vld [vmem:[#allocation7 + $0x78] sm:$0xff] }
  0x7b   : > { %1084 = vmatprep.subr.bf16.mxu1 %v1420_v0 }
  0x7e   : > { %1056 = vmatpush3.bf16.xpose.msra.mxu0 %v1055_v10  ;;  %1086 = vmatpush3.bf16.msra.mxu1 %v1061_v16  ;;  %v343_v10 = vld [vmem:[#allocation7 + $0x28] sm:$0xff] }
  0x7f   : > { %1057 = vmatprep.subr.bf16.mxu0 %v1420_v0  ;;  %1087 = vmatprep.subr.bf16.mxu1 %v1420_v0  ;;  %v1103_v11 = vpack.c.bf16 %v343_v10, %v342_v9 }
  0x82   : > { %1089 = vmatpush3.bf16.msra.mxu1 %v1064_v19 }
  0x83   : > { %1090 = vmatprep.subr.bf16.mxu1 %v1420_v0 }
  0x86   : > { %1059 = vmatpush3.bf16.xpose.msra.mxu0 %v1058_v13  ;;  %1092 = vmatpush3.bf16.msra.mxu1 %v1067_v22  ;;  %v345_v13 = vld [vmem:[#allocation7 + $0x38] sm:$0xff] }
  0x87   : > { %1060 = vmatprep.subr.bf16.mxu0 %v1420_v0  ;;  %1093 = vmatprep.subr.bf16.mxu1 %v1420_v0  ;;  %v1106_v14 = vpack.c.bf16 %v345_v13, %v344_v12 }
  0x8a   : > { %1095 = vmatpush3.bf16.msra.mxu1 %v1070_v25 }
  0x8b   : > { %1096 = vmatprep.subr.bf16.mxu1 %v1420_v0 }
  0x8e   : > { %1062 = vmatpush3.bf16.xpose.msra.mxu0 %v1061_v16  ;;  %v347_v16 = vld [vmem:[#allocation7 + $0x48] sm:$0xff] }
  0x8f   : > { %1063 = vmatprep.subr.bf16.mxu0 %v1420_v0  ;;  %v1109_v17 = vpack.c.bf16 %v347_v16, %v346_v15 }
  0x96   : > { %1065 = vmatpush3.bf16.xpose.msra.mxu0 %v1064_v19 }
  0x97   : > { %1066 = vmatprep.subr.bf16.mxu0 %v1420_v0 }
  0x9e   : > { %1068 = vmatpush3.bf16.xpose.msra.mxu0 %v1067_v22  ;;  %v1115_v22 = vpack.c.bf16 %v351_v21, %v350_v20 }
  0x9f   : > { %1069 = vmatprep.subr.bf16.mxu0 %v1420_v0 }
  0xa6   : > { %1071 = vmatpush3.bf16.xpose.msra.mxu0 %v1070_v25  ;;  %v1118_v25 = vpack.c.bf16 %v353_v24, %v352_v23 }
  0xa7   : > { %1120 = vmatprep.subr.bf16.mxu0 %v1420_v0 }
  0xad   : > { %941 = vmatmul.mubr.f32.vlgmr.msra.gmra.mrb[0].mxu0 %v1698_v26 }
  0xae   : > { %1045 = vmatprep.mubr.msk.f32.mxu0 %vm1421_vm0, %v1422_v1  ;;  %1122 = vmatpush3.bf16.msra.mxu0 %v1121_v40 }
  0xaf   : > { %1123 = vmatprep.subr.bf16.mxu0 %v1420_v0 }
  0xb2   : > { %1125 = vmatpush3.bf16.msra.mxu0 %v1124_v43 }
  0xb3   : > { %1126 = vmatprep.subr.bf16.mxu0 %v1420_v0 }
  0xb6   : > { %1128 = vmatpush3.bf16.msra.mxu0 %v1127_v46 }
  0xb7   : > { %1129 = vmatprep.subr.bf16.mxu0 %v1420_v0 }
  0xba   : > { %1131 = vmatpush3.bf16.msra.mxu0 %v1130_v49 }
  0xbb   : > { %1132 = vmatprep.subr.bf16.mxu0 %v1420_v0 }
  0xbe   : > { %1134 = vmatpush3.bf16.msra.mxu0 %v1133_v52 }
  0xbf   : > { %1135 = vmatprep.subr.bf16.mxu0 %v1420_v0 }
  0xc2   : > { %1137 = vmatpush3.bf16.msra.mxu0 %v1136_v55 }
  0xc3   : > { %1138 = vmatprep.subr.bf16.mxu0 %v1420_v0 }
  0xc6   : > { %1140 = vmatpush3.bf16.msra.mxu0 %v1139_v58 }
  0xc7   : > { %1141 = vmatprep.subr.bf16.mxu0 %v1420_v0 }
  0xca   : > { %1143 = vmatpush3.bf16.msra.mxu0 %v1142_v61 }
 0x180   : > { %v441_v29 = vpop.f32.mrb[0].mxu0 }
 0x181   : > { %v445_v30 = vsel %vm357_vm1, %v441_v29, -inf  ;;  %v942_v31 = vpop.f32.mrb[1].mxu0 }
 0x182   : > { %v447_v32 = vsel %vm446_vm2, %v445_v30, -inf }
 0x183   : > { %448 = vmax.xlane.f32.xlu0 %v447_v32 }
 0x210   : > { %v449_v33 = vpop.xlane.xlu0 %448 }
 0x211   : > { %v450_v34 = vsub.f32 %v445_v30, %v449_v33 }
 0x213   : > { %v451_v35 = vmul.f32 1.442695, %v450_v34 }
 0x215   : > { %1221 = vpow2.f32 %v451_v35 }
 0x21f   : > { %v1222_v36 = vpop.eup %1221 }
 0x220   : > { %v453_v37 = vsel %vm446_vm2, %v1222_v36, 0.0 }
 0x221   : > { %454 = vadd.xlane.f32.xlu0 %v453_v37 }
 0x2ae   : > { %v455_v62 = vpop.xlane.xlu0 %454 }
 0x2af   : > { %1223 = vrcp.f32 %v455_v62 }
 0x2b9   : > { %v1224_v3 = vpop.eup %1223 }
 0x2ba   : > { %v457_v5 = vmul.f32 %v1224_v3, %v1222_v36 }
 0x2bc   : > { %976 = vmatmul.mubr.f32.vlgmr.msra.gmra.mrb[0].mxu1 %v457_v5  ;;  %458 = vst [vmem:[%s318_s16] sm:$0x1] %v457_v5 }
 0x2bd   : > { %1098 = vmatpush3.bf16.msra.mxu1 %v1097_v4  ;;  %1010 = vmatprep.mubr.msk.f32.mxu1 %vm1421_vm0, %v1422_v1  ;;  %v348_v1 = vld [vmem:[#allocation7 + $0x50] sm:$0xff] }
 0x2be   : > { %1099 = vmatprep.subr.bf16.mxu1 %v1420_v0  ;;  %v1112_v19 = vpack.c.bf16 %v349_v18, %v348_v1 }
 0x2c1   : > { %1101 = vmatpush3.bf16.msra.mxu1 %v1100_v8 }
 0x2c2   : > { %1102 = vmatprep.subr.bf16.mxu1 %v1420_v0 }
 0x2c5   : > { %1104 = vmatpush3.bf16.msra.mxu1 %v1103_v11 }
 0x2c6   : > { %1105 = vmatprep.subr.bf16.mxu1 %v1420_v0 }
 0x2c9   : > { %1107 = vmatpush3.bf16.msra.mxu1 %v1106_v14 }
 0x2ca   : > { %1108 = vmatprep.subr.bf16.mxu1 %v1420_v0 }
 0x2cd   : > { %1110 = vmatpush3.bf16.msra.mxu1 %v1109_v17 }
 0x2ce   : > { %1111 = vmatprep.subr.bf16.mxu1 %v1420_v0 }
 0x2d1   : > { %1113 = vmatpush3.bf16.msra.mxu1 %v1112_v19 }
 0x2d2   : > { %1114 = vmatprep.subr.bf16.mxu1 %v1420_v0 }
 0x2d5   : > { %1116 = vmatpush3.bf16.msra.mxu1 %v1115_v22 }
 0x2d6   : > { %1117 = vmatprep.subr.bf16.mxu1 %v1420_v0 }
 0x2d9   : > { %1119 = vmatpush3.bf16.msra.mxu1 %v1118_v25 }
 0x2dc   : > { %1011 = vmatmul.mubr.f32.vlgmr.msra.gmra.mrb[2].mxu1 %v1698_v26 }
 0x38f   : > { %v525_v27 = vpop.f32.mrb[0].mxu1 }
 0x390   : > { %v977_v28 = vpop.f32.mrb[1].mxu1  ;;  %1046 = vmatmul.mubr.f32.vlgmr.msra.gmra.mrb[2].mxu0 %v525_v27 }
 0x3af   : > { %v595_v29 = vpop.f32.mrb[2].mxu1 }
 0x3b0   : > { %v1012_v30 = vpop.f32.mrb[3].mxu1 }
 0x3b1   : > { %1324 = shalt.err (!%p1321_p13)
}
 0x3b2   : > { %s1325_s29 = scalar_lea.hbm %s1729_s13, 16  ;;  %s1329_s16 = scalar_lea.hbm %s1810_s6, 32 }
 0x3b3   : > { %p1326_p6 = scmp.ne.s32.totalorder %s1729_s13, %s1325_s29  ;;  %p1330_p5 = scmp.lt.u32.totalorder %s1729_s13, %s1810_s6 }
 0x3b4   : > { %p1331_p8 = scmp.lt.u32.totalorder %s1329_s16, %s1325_s29  ;;  %p1333_p0 = scmp.lt.u32.totalorder %s1325_s29, %s1729_s13 }
 0x3b5   : > { %p1327_p10 = pnand %p1326_p6, %p1824_p2 }
 0x3b6   : > { %p1332_p11 = por %p1331_p8, %p1330_p5 }
 0x3b7   : > { %p1328_p4 = pneg %p1327_p10 }
 0x3b8   : > { %p1334_p3 = por %p1333_p0, %p1332_p11 }
 0x3ba   : > { %p1335_p7 = pnand %p1334_p3, %p1328_p4 }
 0x3bc   : > { %1338 = shalt.err (!%p1335_p7)
}
 0x3bd   : > { %1155 = dma.vmem_to_hbm [thread:$0]  (%p1824_p2), %s702_s10, 16, %s1729_s13, %s676_s15   ;;  %v354_v0 = vld [vmem:[%s1808_s4] sm:$0x1] }
 0x3be   : > { %s312_s12 = scalar_lea.vmem [#allocation8], %s1641_s30  ;;  %s1760_s20 = scalar_lea.hbm %s1809_s5, %s835_s17 }
 0x3bf   : > { %s688_s27 = sshll.u32 %s312_s12, 4  ;;  %s672_s13 = scalar_lea.sflag [#allocation4], %s1641_s30  ;;  %s1762_s27 = int_to_ptr.vmem [resolvable:$true] %s688_s27 }
 0x3c0   : > { %s1339_s10 = scalar_lea.vmem %s1762_s27, 16  ;;  %s1424_s15 = smov [#allocation8]  }
 0x3c1   : > { %p1340_p9 = scmp.ne.s32.totalorder %s1762_s27, %s1339_s10  ;;  %s1343_s16 = sshll.u32 %s1424_s15, 4  ;;  %s1344_s16 = int_to_ptr.vmem [resolvable:$false] %s1343_s16 }
 0x3c2   : > { %s1345_s25 = scalar_lea.vmem %s1344_s16, 32  ;;  %p1346_p13 = scmp.lt.s32.totalorder %s1762_s27, %s1344_s16 }
 0x3c3   : > { %p1341_p12 = pnand %p1340_p9, %p1824_p2  ;;  %p1347_p6 = scmp.lt.s32.totalorder %s1345_s25, %s1339_s10 }
 0x3c5   : > { %p1342_p1 = pneg %p1341_p12  ;;  %p1348_p10 = por %p1347_p6, %p1346_p13 }
 0x3c7   : > { %p1349_p4 = pnand %p1348_p10, %p1342_p1 }
 0x463   : > { %v665_v26 = vpop.f32.mrb[2].mxu0 }
 0x464   : > { %v666_v31 = vadd.f32 %v665_v26, %v595_v29  ;;  %v1047_v32 = vpop.f32.mrb[3].mxu0 }
 0x466   : > { %v669_v33 = vadd.f32 %v666_v31, %v354_v0 }
 0x468   : > { %670 = vst [vmem:[%s312_s12] sm:$0x1] %v669_v33 }
 0x469   : > { %1352 = shalt.err (!%p1349_p4)
}
 0x46a   : > { %s1353_s30 = scalar_lea.hbm %s1760_s20, 16  ;;  %s1357_s26 = scalar_lea.hbm %s1809_s5, 32 }
 0x46b   : > { %p1354_p5 = scmp.ne.s32.totalorder %s1760_s20, %s1353_s30  ;;  %p1358_p0 = scmp.lt.u32.totalorder %s1760_s20, %s1809_s5 }
 0x46c   : > { %p1359_p3 = scmp.lt.u32.totalorder %s1357_s26, %s1353_s30  ;;  %p1361_p9 = scmp.lt.u32.totalorder %s1353_s30, %s1760_s20 }
 0x46d   : > { %p1355_p8 = pnand %p1354_p5, %p1824_p2 }
 0x46e   : > { %p1360_p7 = por %p1359_p3, %p1358_p0 }
 0x46f   : > { %p1356_p11 = pneg %p1355_p8 }
 0x470   : > { %p1362_p12 = por %p1361_p9, %p1360_p7 }
 0x472   : > { %p1363_p1 = pnand %p1362_p12, %p1356_p11 }
 0x474   : > { %1366 = shalt.err (!%p1363_p1)
}
 0x475   : > { %1154 = dma.vmem_to_hbm [thread:$0]  (%p1824_p2), %s1762_s27, 16, %s1760_s20, %s672_s13  }
 0x476 PF: > { %s713_s12 = sand.u32 1, %s1401_s21   ;;  %p1825_p13 = scmp.ne.s32.totalorder %s1815_s28, 0 }
 0x477   : > { %p1826_p6 = scmp.ge.s32.totalorder %s1413_s24, 2  ;;  %s714_s29 = scalar_lea.sflag [#allocation4], %s713_s12 }
 0x479   : > { %p1170_p10 = pnand %p1826_p6, %p1825_p13 }
 0x47b   : > { %1392 = dma.done.wait (!%p1170_p10), %s714_s29, 16  }
 0x47c   : > { %1394 = vsyncadd (!%p1170_p10), %s714_s29, 4294967280  ;;  %s722_s19 = scalar_lea.sflag [#allocation10], %s713_s12 }
 0x47d   : > { %1396 = dma.done.wait (!%p1170_p10), %s722_s19, 16  }
 0x47e   : > { %1398 = vsyncadd (!%p1170_p10), %s722_s19, 4294967280  ;;  %p24_p2 = scmp.ge.s32.totalorder %s1576_s8, 4   ;;  %s1827_s21 = smov %s1405_s22 }
 0x47f   : > { %s1828_s22 = smov %s1409_s23  ;;  %s1829_s23 = smov %s1592_s11 }
 0x480   : > { %s1830_s24 = smov %s1576_s8  ;;  %26 = sbr.rel (!%p24_p2) target bundleno = 8 (0x8), region = 113 }
 0x487   :  { %726 = vsyncpa [#allocation3], 1 }
 0x488   :  { %728 = vsyncpa [#allocation3 + $0x1], 1 }
 0x489   :  { %729 = vsyncpa [#allocation6], 1 }
 0x48a   :  { %730 = vsyncpa [#allocation4], 1 }
 0x48b   :  { %732 = vsyncpa [#allocation4 + $0x1], 1 }
 0x48c   :  { %733 = vsyncpa [#allocation10], 1 }
 0x48d   :  { %735 = vsyncpa [#allocation10 + $0x1], 1 }

</bundles_post_ra>
